<compile_context>
chip_gen: v7x
topology: tpu7x:2x2x1
jax: 0.10.0
libtpu: 0.0.40
codegen_flags: <defaults>
</compile_context>

<pallas_src>
import math

import jax
import jax.numpy as jnp
from jax.experimental import pallas as pl
from jax.experimental.pallas import tpu as pltpu


LANE = 128          # lane width (hidden-dim padding target)
SUBLANE = 8         # f32 sublane width (batch tile granularity)
MAX_BATCH_TILE = 1024


def _round_up(x, m):
    return (x + m - 1) // m * m


def _pick_batch_tile(batch):
    """Static batch-tile selection.

    * tiny batches: a single full-dim block (exempt from the 8-row rule, no pad)
    * otherwise: at least 2 tiles (so v7x's two TensorCores both get work),
      each a multiple of 8 rows, capped at MAX_BATCH_TILE (large tiles amortize
      the ~0.35us/step grid overhead).  Grids use pl.cdiv, so the tail block
      may be partial -- no batch rounding/padding needed.
    """
    if batch <= 2 * SUBLANE:
        return batch
    half = _round_up(pl.cdiv(batch, 2), SUBLANE)
    return min(MAX_BATCH_TILE, half)


# ----------------------------- Pallas kernels ------------------------------

def _fused_mlp_kernel(x_ref, w1_ref, b1_ref, w2_ref, b2_ref, o_ref):
    # y = ReLU(x @ W1 + b1) @ W2 + b2
    # Two MXU matmuls with f32 accumulation; bias add + ReLU are VPU filler.
    # The hidden activation stays entirely in vregs/VMEM (no HBM round-trip).
    h = jnp.dot(x_ref[...], w1_ref[...], preferred_element_type=jnp.float32)
    h = jnp.maximum(h + b1_ref[...], 0.0)
    y = jnp.dot(h.astype(w2_ref.dtype), w2_ref[...],
                preferred_element_type=jnp.float32)
    o_ref[...] = (y + b2_ref[...]).astype(o_ref.dtype)


def _linear_kernel(x_ref, w_ref, b_ref, o_ref):
    y = jnp.dot(x_ref[...], w_ref[...], preferred_element_type=jnp.float32)
    o_ref[...] = (y + b_ref[...]).astype(o_ref.dtype)


def _relu_kernel(x_ref, o_ref):
    o_ref[...] = jnp.maximum(x_ref[...], 0.0).astype(o_ref.dtype)


# ------------------------- fused pipeline wrapper ---------------------------

@jax.jit
def _fused_mlp(x, w1p, b1p, w2p, b2p):
    """ReLU(x @ W1 + b1) @ W2 + b2, one pallas_call, compact x / out blocks.

    W1: (d_in, d_hid_p)  -- only the hidden (output) dim is 128-padded.
    W2: (d_hid_p, d_out) -- only the hidden (input)  dim is 128-padded.
    Zero padding is exact: padded hidden columns are ReLU(0 + 0) = 0 and hit
    zero W2 rows.
    """
    batch, d_in = x.shape
    d_hid_p = w1p.shape[1]
    d_out = w2p.shape[1]

    tb = _pick_batch_tile(batch)
    grid = (pl.cdiv(batch, tb),)

    # VMEM: (tb, d_in) + (tb, d_out) f32 tiles (double-buffered) plus ~17 KiB
    # of resident weights -> far under the scoped limit on every generation.
    return pl.pallas_call(
        _fused_mlp_kernel,
        out_shape=jax.ShapeDtypeStruct((batch, d_out), x.dtype),
        grid_spec=pltpu.PrefetchScalarGridSpec(
            num_scalar_prefetch=0,
            grid=grid,
            in_specs=[
                pl.BlockSpec((tb, d_in), lambda i: (i, 0)),         # x tile (compact)
                pl.BlockSpec((d_in, d_hid_p), lambda i: (0, 0)),    # W1 resident
                pl.BlockSpec((1, d_hid_p), lambda i: (0, 0)),       # b1 resident
                pl.BlockSpec((d_hid_p, d_out), lambda i: (0, 0)),   # W2 resident
                pl.BlockSpec((1, d_out), lambda i: (0, 0)),         # b2 resident
            ],
            # Compact output: d_out < 128 lanes costs masked stores but ~8x
            # fewer HBM bytes on this memory-bound op, and no trailing slice.
            out_specs=pl.BlockSpec((tb, d_out), lambda i: (i, 0)),
        ),
        compiler_params=pltpu.CompilerParams(
            dimension_semantics=("parallel",)),  # shard batch tiles on v7x
    )(x, w1p, b1p, w2p, b2p)


# ----------------------------- module wrappers ------------------------------

class PallasLinear:
    """nn.Linear equivalent.  Parameters kept unpadded; stored as (in, out)
    so kernels compute y = x @ W + b (PyTorch stores (out, in))."""

    def __init__(self, key, in_features, out_features, dtype=jnp.float32):
        kw, kb = jax.random.split(key)
        bound = 1.0 / math.sqrt(in_features)
        self.w = jax.random.uniform(
            kw, (in_features, out_features), dtype, minval=-bound, maxval=bound)
        self.b = jax.random.uniform(
            kb, (1, out_features), dtype, minval=-bound, maxval=bound)
        self.in_features = in_features
        self.out_features = out_features

    def __call__(self, x):
        # Standalone (fallback) path: batch-tiled grid, compact feature blocks
        # (block dims equal to the full feature dims are exempt from (8,128)).
        batch, d_in = x.shape
        d_out = self.out_features
        tb = _pick_batch_tile(batch)
        grid = (pl.cdiv(batch, tb),)
        return pl.pallas_call(
            _linear_kernel,
            out_shape=jax.ShapeDtypeStruct((batch, d_out), x.dtype),
            grid_spec=pltpu.PrefetchScalarGridSpec(
                num_scalar_prefetch=0,
                grid=grid,
                in_specs=[
                    pl.BlockSpec((tb, d_in), lambda i: (i, 0)),
                    pl.BlockSpec((d_in, d_out), lambda i: (0, 0)),
                    pl.BlockSpec((1, d_out), lambda i: (0, 0)),
                ],
                out_specs=pl.BlockSpec((tb, d_out), lambda i: (i, 0)),
            ),
            compiler_params=pltpu.CompilerParams(
                dimension_semantics=("parallel",)),
        )(x, self.w, self.b)


class PallasReLU:
    """nn.ReLU equivalent backed by a batch-tiled Pallas kernel (fallback path)."""

    def __call__(self, x):
        batch, d = x.shape
        tb = _pick_batch_tile(batch)
        grid = (pl.cdiv(batch, tb),)
        return pl.pallas_call(
            _relu_kernel,
            out_shape=jax.ShapeDtypeStruct(x.shape, x.dtype),
            grid_spec=pltpu.PrefetchScalarGridSpec(
                num_scalar_prefetch=0,
                grid=grid,
                in_specs=[pl.BlockSpec((tb, d), lambda i: (i, 0))],
                out_specs=pl.BlockSpec((tb, d), lambda i: (i, 0)),
            ),
            compiler_params=pltpu.CompilerParams(
                dimension_semantics=("parallel",)),
        )(x)


class Compose:
    """Exact semantics of the PyTorch Compose: apply submodules in reversed
    order.  When the reversed pipeline is Linear -> ReLU -> Linear it is fused
    into a single Pallas kernel (same math, one launch); the lane-padded
    weight copies are built ONCE here, not per call."""

    def __init__(self, *modules):
        self.modules = modules
        self._fused_params = None
        pipeline = tuple(reversed(modules))  # execution order
        if (len(pipeline) == 3
                and isinstance(pipeline[0], PallasLinear)
                and isinstance(pipeline[1], PallasReLU)
                and isinstance(pipeline[2], PallasLinear)
                and pipeline[0].out_features == pipeline[2].in_features):
            lin1, _, lin2 = pipeline
            d_hid = lin1.out_features
            d_hid_p = _round_up(d_hid, LANE)
            dtype = lin1.w.dtype
            w1p = jnp.zeros((lin1.in_features, d_hid_p), dtype)
            w1p = w1p.at[:, :d_hid].set(lin1.w)
            b1p = jnp.zeros((1, d_hid_p), dtype).at[:, :d_hid].set(lin1.b)
            w2p = jnp.zeros((d_hid_p, lin2.out_features), dtype)
            w2p = w2p.at[:d_hid, :].set(lin2.w)
            b2p = lin2.b                       # (1, d_out), already compact
            self._fused_params = (w1p, b1p, w2p, b2p)

    def __call__(self, x):
        if self._fused_params is not None:
            return _fused_mlp(x, *self._fused_params)
        # Generic fallback: per-module Pallas kernels, reversed order.
        for module in reversed(self.modules):
            x = module(x)
        return x


# --------------------------------- main -------------------------------------

if __name__ == "__main__":
    key = jax.random.PRNGKey(0)
    k_in, k_lin1, k_lin2 = jax.random.split(key, 3)

    batch, d_in, d_hidden = 8, 16, 32

    # Compose(Linear(32->16), ReLU, Linear(16->32)): reversed application runs
    # Linear(16->32) first, then ReLU, then Linear(32->16).
    model = Compose(
        PallasLinear(k_lin1, d_hidden, d_in),    # applied last   (32 -> 16)
        PallasReLU(),                            # applied second
        PallasLinear(k_lin2, d_in, d_hidden),    # applied first  (16 -> 32)
    )

    x = jax.random.normal(k_in, (batch, d_in), jnp.float32)

    out = jax.block_until_ready(model(x))

    # Reference of the same reversed pipeline in plain JAX (unpadded params).
    lin_first, lin_last = model.modules[2], model.modules[0]
    ref = jnp.maximum(x @ lin_first.w + lin_first.b, 0.0)
    ref = ref @ lin_last.w + lin_last.b
    assert out.shape == (batch, d_in)
    assert jnp.allclose(out, ref, atol=1e-5, rtol=1e-5)

    # Also exercise the generic (non-fused) fallback path once:
    # Compose(ReLU, Linear) applies Linear first, then ReLU.
    fb = Compose(PallasReLU(), PallasLinear(k_lin2, d_in, d_hidden))
    out_fb = jax.block_until_ready(fb(x))
    ref_fb = jnp.maximum(x @ fb.modules[1].w + fb.modules[1].b, 0.0)
    assert jnp.allclose(out_fb, ref_fb, atol=1e-5, rtol=1e-5)

    print("KERNEL_OK")
</pallas_src>

<mosaic_0001>
module attributes {stable_mosaic.version = 11 : i64} {
  func.func @_fused_mlp_kernel(%arg0: i32, %arg1: memref<8x16xf32, #tpu.memory_space<vmem>>, %arg2: memref<16x128xf32, #tpu.memory_space<vmem>>, %arg3: memref<1x128xf32, #tpu.memory_space<vmem>>, %arg4: memref<128x16xf32, #tpu.memory_space<vmem>>, %arg5: memref<1x16xf32, #tpu.memory_space<vmem>>, %arg6: memref<8x16xf32, #tpu.memory_space<vmem>>) attributes {dimension_semantics = [#tpu.dimension_semantics<parallel>], iteration_bounds = array<i64: 1>, scalar_prefetch = 0 : i64, scratch_operands = 0 : i64, tpu.core_type = #tpu.core_type<tc>, window_params = [{transform_indices = @transform_0, window_bounds = array<i64: 8, 16>}, {pipeline_mode = #tpu.pipeline_mode<synchronous>, transform_indices = @transform_1, window_bounds = array<i64: 16, 128>}, {pipeline_mode = #tpu.pipeline_mode<synchronous>, transform_indices = @transform_2, window_bounds = array<i64: 1, 128>}, {pipeline_mode = #tpu.pipeline_mode<synchronous>, transform_indices = @transform_3, window_bounds = array<i64: 128, 16>}, {pipeline_mode = #tpu.pipeline_mode<synchronous>, transform_indices = @transform_4, window_bounds = array<i64: 1, 16>}, {transform_indices = @transform_5, window_bounds = array<i64: 8, 16>}]} {
    %c0 = arith.constant 0 : index
    %c0_0 = arith.constant 0 : index
    %0 = vector.load %arg1[%c0, %c0_0] : memref<8x16xf32, #tpu.memory_space<vmem>>, vector<8x16xf32>
    %c0_1 = arith.constant 0 : index
    %c0_2 = arith.constant 0 : index
    %1 = vector.load %arg2[%c0_1, %c0_2] : memref<16x128xf32, #tpu.memory_space<vmem>>, vector<16x128xf32>
    %cst = arith.constant dense<0.000000e+00> : vector<8x128xf32>
    %2 = tpu.matmul %0, %1, %cst {dimension_numbers = #tpu.dot_dimension_numbers<[1], [0], [0], [1], [0, 0, 1, 1], [], []>} : vector<8x16xf32>, vector<16x128xf32>, vector<8x128xf32> -> vector<8x128xf32>
    %c0_3 = arith.constant 0 : index
    %c0_4 = arith.constant 0 : index
    %3 = vector.load %arg3[%c0_3, %c0_4] : memref<1x128xf32, #tpu.memory_space<vmem>>, vector<1x128xf32>
    %4 = vector.broadcast %3 : vector<1x128xf32> to vector<8x128xf32>
    %5 = arith.addf %2, %4 : vector<8x128xf32>
    %cst_5 = arith.constant 0.000000e+00 : f32
    %6 = vector.broadcast %cst_5 : f32 to vector<8x128xf32>
    %7 = arith.maximumf %5, %6 : vector<8x128xf32>
    %c0_6 = arith.constant 0 : index
    %c0_7 = arith.constant 0 : index
    %8 = vector.load %arg4[%c0_6, %c0_7] : memref<128x16xf32, #tpu.memory_space<vmem>>, vector<128x16xf32>
    %cst_8 = arith.constant dense<0.000000e+00> : vector<8x16xf32>
    %9 = tpu.matmul %7, %8, %cst_8 {dimension_numbers = #tpu.dot_dimension_numbers<[1], [0], [0], [1], [0, 0, 1, 1], [], []>} : vector<8x128xf32>, vector<128x16xf32>, vector<8x16xf32> -> vector<8x16xf32>
    %c0_9 = arith.constant 0 : index
    %c0_10 = arith.constant 0 : index
    %10 = vector.load %arg5[%c0_9, %c0_10] : memref<1x16xf32, #tpu.memory_space<vmem>>, vector<1x16xf32>
    %11 = vector.broadcast %10 : vector<1x16xf32> to vector<8x16xf32>
    %12 = arith.addf %9, %11 : vector<8x16xf32>
    %c0_11 = arith.constant 0 : index
    %c0_12 = arith.constant 0 : index
    %13 = vector.load %arg6[%c0_11, %c0_12] : memref<8x16xf32, #tpu.memory_space<vmem>>, vector<8x16xf32>
    tpu.vector_store %arg6[%c0_11, %c0_12], %12 {strides = array<i32>} : memref<8x16xf32, #tpu.memory_space<vmem>>, vector<8x16xf32>,
    return
  }
  func.func @transform_0(%arg0: i32) -> (i32, i32) {
    %c0_i32 = arith.constant 0 : i32
    %c0_i32_0 = arith.constant 0 : i32
    return %arg0, %c0_i32 : i32, i32
  }
  func.func @transform_1(%arg0: i32) -> (i32, i32) {
    %c0_i32 = arith.constant 0 : i32
    %c0_i32_0 = arith.constant 0 : i32
    %c0_i32_1 = arith.constant 0 : i32
    return %c0_i32, %c0_i32_0 : i32, i32
  }
  func.func @transform_2(%arg0: i32) -> (i32, i32) {
    %c0_i32 = arith.constant 0 : i32
    %c0_i32_0 = arith.constant 0 : i32
    %c0_i32_1 = arith.constant 0 : i32
    return %c0_i32, %c0_i32_0 : i32, i32
  }
  func.func @transform_3(%arg0: i32) -> (i32, i32) {
    %c0_i32 = arith.constant 0 : i32
    %c0_i32_0 = arith.constant 0 : i32
    %c0_i32_1 = arith.constant 0 : i32
    return %c0_i32, %c0_i32_0 : i32, i32
  }
  func.func @transform_4(%arg0: i32) -> (i32, i32) {
    %c0_i32 = arith.constant 0 : i32
    %c0_i32_0 = arith.constant 0 : i32
    %c0_i32_1 = arith.constant 0 : i32
    return %c0_i32, %c0_i32_0 : i32, i32
  }
  func.func @transform_5(%arg0: i32) -> (i32, i32) {
    %c0_i32 = arith.constant 0 : i32
    %c0_i32_0 = arith.constant 0 : i32
    return %arg0, %c0_i32 : i32, i32
  }
}

</mosaic_0001>

<bundles_post_ra>
// kernel: _fused_mlp.1
= control target key start
LH: loop header
LB: loop body
LE: loop exit
PB: predicated region body
PF: predicated region fallthrough
CT: control target
= control target key end

     0   :  { %v334_v2 = vmov 0.0|0.0   ;;  %vm335_vm0 = vmmov 0   ;;  %v336_v4 = vmov 0.0   ;;  %vm31_vm1 = vcmask 130048   ;;  %s445_s0 = inlined_call_operand.vmem [shape: f32[8,16], index: 0, kind: input, shape index: {}]   ;;  %s446_s1 = inlined_call_operand.vmem [shape: f32[16,128], index: 1, kind: input, shape index: {}]   ;;  %s447_s2 = inlined_call_operand.vmem [shape: f32[1,128], index: 2, kind: input, shape index: {}]   ;;  %s448_s3 = inlined_call_operand.vmem [shape: f32[128,16], index: 3, kind: input, shape index: {}]   ;;  %s449_s4 = inlined_call_operand.vmem [shape: f32[1,16], index: 4, kind: input, shape index: {}]   ;;  %s450_s5 = inlined_call_operand.hbm [shape: f32[8,16], index: 5, kind: output, shape index: {}]  }
   0x1   :  { %v22_v0 = vld [vmem:[%s446_s1] sm:$0xff]  ;;  %v23_v1 = vld [vmem:[%s446_s1 + $0x8] sm:$0xff]  ;;  %279 = vmatprep.subr.bf16.mxu0 %v334_v2  ;;  %241 = vmatprep.mubr.msk.f32.mxu0 %vm335_vm0, %v336_v4  ;;  %v108_v7 = vld [vmem:[%s448_s3 + $0x10] sm:$0xff] }
   0x2   :  { %v280_v3 = vpack.c.bf16 %v23_v1, %v22_v0  ;;  %v106_v5 = vld [vmem:[%s448_s3] sm:$0xff]  ;;  %v107_v6 = vld [vmem:[%s448_s3 + $0x8] sm:$0xff]  ;;  %282 = vmatprep.subr.bf16.mxu1 %v334_v2  ;;  %v109_v9 = vld [vmem:[%s448_s3 + $0x18] sm:$0xff]  ;;  %276 = vmatprep.mubr.msk.f32.mxu1 %vm335_vm0, %v336_v4 }
   0x3   :  { %v283_v8 = vpack.c.bf16 %v107_v6, %v106_v5  ;;  %v21_v10 = vld [vmem:[%s445_s0] sm:$0xff]  ;;  %v286_v11 = vpack.c.bf16 %v109_v9, %v108_v7  ;;  %v111_v13 = vld [vmem:[%s448_s3 + $0x28] sm:$0xff] }
   0x4   :  { %281 = vmatpush3.bf16.msra.mxu0 %v280_v3  ;;  %v110_v12 = vld [vmem:[%s448_s3 + $0x20] sm:$0xff] }
   0x5   :  { %284 = vmatpush3.bf16.msra.mxu1 %v283_v8 }
   0x6   :  { %285 = vmatprep.subr.bf16.mxu1 %v334_v2 }
   0x7   :  { %242 = vmatmul.mubr.msk.f32.vlgmr.msra.gmra.mrb[0].mxu0 %vm31_vm1, %v21_v10 }
   0x8   :  { %10 = vsyncpa [#allocation3], 0  ;;  %v289_v14 = vpack.c.bf16 %v111_v13, %v110_v12  ;;  %v112_v15 = vld [vmem:[%s448_s3 + $0x30] sm:$0xff]  ;;  %v113_v16 = vld [vmem:[%s448_s3 + $0x38] sm:$0xff]  ;;  %s337_s7 = smov [#allocation2]  }
   0x9   :  { %287 = vmatpush3.bf16.msra.mxu1 %v286_v11  ;;  %v292_v17 = vpack.c.bf16 %v113_v16, %v112_v15  ;;  %v114_v18 = vld [vmem:[%s448_s3 + $0x40] sm:$0xff]  ;;  %v115_v19 = vld [vmem:[%s448_s3 + $0x48] sm:$0xff]  ;;  %v116_v21 = vld [vmem:[%s448_s3 + $0x50] sm:$0xff]  ;;  %s206_s8 = sshll.u32 %s337_s7, 4  ;;  %s207_s8 = int_to_ptr.vmem [resolvable:$true] %s206_s8 }
   0xa   :  { %288 = vmatprep.subr.bf16.mxu1 %v334_v2  ;;  %v295_v20 = vpack.c.bf16 %v115_v19, %v114_v18  ;;  %v117_v22 = vld [vmem:[%s448_s3 + $0x58] sm:$0xff]  ;;  %v118_v24 = vld [vmem:[%s448_s3 + $0x60] sm:$0xff]  ;;  %v119_v25 = vld [vmem:[%s448_s3 + $0x68] sm:$0xff]  ;;  %p315_p1 = scmp.lt.s32.totalorder %s207_s8, %s207_s8 }
   0xb   :  { %v298_v23 = vpack.c.bf16 %v117_v22, %v116_v21  ;;  %v301_v26 = vpack.c.bf16 %v119_v25, %v118_v24  ;;  %v120_v27 = vld [vmem:[%s448_s3 + $0x70] sm:$0xff]  ;;  %v121_v28 = vld [vmem:[%s448_s3 + $0x78] sm:$0xff]  ;;  %v214_v30 = vld [vmem:[%s447_s2] ss:$0 sm:$0xff]  ;;  %s310_s3 = scalar_lea.vmem %s207_s8, 128 }
   0xc   :  { %v304_v29 = vpack.c.bf16 %v121_v28, %v120_v27  ;;  %v216_v35 = vld [vmem:[%s449_s4] ss:$0 sm:$0xff]  ;;  %p311_p0 = scmp.ne.s32.totalorder %s207_s8, %s310_s3  ;;  %p316_p2 = scmp.lt.s32.totalorder %s310_s3, %s310_s3 }
   0xd   :  { %290 = vmatpush3.bf16.msra.mxu1 %v289_v14 }
   0xe   :  { %291 = vmatprep.subr.bf16.mxu1 %v334_v2  ;;  %p317_p3 = por %p316_p2, %p315_p1 }
  0x10   :  { %p318_p4 = pnand %p317_p3, %p311_p0 }
  0x11   :  { %293 = vmatpush3.bf16.msra.mxu1 %v292_v17 }
  0x12   :  { %294 = vmatprep.subr.bf16.mxu1 %v334_v2 }
  0x15   :  { %296 = vmatpush3.bf16.msra.mxu1 %v295_v20 }
  0x16   :  { %297 = vmatprep.subr.bf16.mxu1 %v334_v2 }
  0x19   :  { %299 = vmatpush3.bf16.msra.mxu1 %v298_v23 }
  0x1a   :  { %300 = vmatprep.subr.bf16.mxu1 %v334_v2 }
  0x1d   :  { %302 = vmatpush3.bf16.msra.mxu1 %v301_v26 }
  0x1e   :  { %303 = vmatprep.subr.bf16.mxu1 %v334_v2 }
  0x21   :  { %305 = vmatpush3.bf16.msra.mxu1 %v304_v29 }
  0xda   :  { %v101_v31 = vpop.f32.mrb[0].mxu0 }
  0xdb   :  { %v102_v32 = vadd.f32 %v214_v30, %v101_v31  ;;  %v243_v33 = vpop.f32.mrb[1].mxu0 }
  0xdd   :  { %v105_v34 = vmax.f32 %v102_v32, 0.0 }
  0xdf   :  { %277 = vmatmul.mubr.f32.vlgmr.msra.gmra.mrb[0].mxu1 %v105_v34 }
 0x1b2   :  { %v195_v36 = vpop.f32.mrb[0].mxu1 }
 0x1b3   :  { %v196_v37 = vadd.f32 %v216_v35, %v195_v36  ;;  %v278_v38 = vpop.f32.mrb[1].mxu1 }
 0x1b5   :  { %199 = vst.msk [vmem:[#allocation2] sm:$0xff] %vm31_vm1, %v196_v37 }
 0x1b6   :  { %321 = shalt.err (!%p318_p4)
}
 0x1b7   :  { %s322_s10 = scalar_lea.hbm %s450_s5, 128 }
 0x1b8   :  { %p323_p5 = scmp.ne.s32.totalorder %s450_s5, %s322_s10  ;;  %p326_p6 = scmp.lt.u32.totalorder %s322_s10, %s450_s5 }
 0x1ba   :  { %p328_p7 = pnand %p326_p6, %p323_p5 }
 0x1bc   :  { %331 = shalt.err (!%p328_p7)
}
 0x1bd   :  { %209 = dma.vmem_to_hbm [thread:$0]  %s207_s8, 128, %s450_s5, [#allocation3]  }
 0x1be   :  { %332 = dma.done.wait [#allocation3], 128  }
 0x1bf   :  { %333 = vsyncadd [#allocation3], 4294967168 }
 0x1c0   :  { %213 = vsyncpa [#allocation3], 1 }

</bundles_post_ra>
